<compile_context>
chip_gen: v6e
topology: v6e:2x2x1
jax: 0.10.0
libtpu: 0.0.40
codegen_flags: <defaults>
</compile_context>

<pallas_src>
import jax
import jax.numpy as jnp
from jax.experimental import pallas as pl
from jax.experimental.pallas import tpu as pltpu

_LANE = 128      # vreg lane width  -> last block dim
_SUBLANE = 8     # f32 sublane count -> second-to-last block dim multiple


def _round_up(a: int, b: int) -> int:
    return -(-a // b) * b


def _lreg_kernel(w_ref, b_ref, x_ref, o_ref):
    # w_ref, b_ref: SMEM (1,) scalars.  x_ref / o_ref: (block_r, 128) VMEM tiles.
    # in_features == out_features == 1  =>  plain VPU fused multiply-add, no MXU.
    o_ref[...] = x_ref[...] * w_ref[0] + b_ref[0]


def lreg_forward(x, weight, bias, *, block_rows=2048, min_kernel_elems=65536):
    """y = x @ weight^T + bias for in_features == out_features == 1.

    x:      (N, 1) float32
    weight: (1, 1)  (PyTorch convention, out_features x in_features)
    bias:   (1,)
    block_rows:       rows per (rows, 128) block; 2048 rows = 1 MiB f32 blocks.
    min_kernel_elems: below this batch size, skip the kernel and let XLA fuse
                      the FMA inline (the module's regime is max_batch_size=2).
    """
    n, in_f = x.shape
    out_f, in_f_w = weight.shape
    assert in_f == 1 and out_f == 1 and in_f_w == 1
    assert x.dtype == jnp.float32, "tiling constants are f32-specific"

    # Tiny/moderate batches: pallas_call launch + DMA setup costs more than the
    # ~4*N FLOPs; a fused XLA FMA is essentially free.
    if n < max(min_kernel_elems, _LANE):
        return x * weight[0, 0] + bias[0]

    # Minimal lane-dense slab: (N,1) -> (rows, 128). No rounding to block
    # multiples; a ragged final grid block is handled by Pallas.
    rows = pl.cdiv(n, _LANE)
    n_slab = rows * _LANE
    tail = n_slab - n                      # 0..127, zero when N % 128 == 0

    flat = x.reshape(-1)                   # (N,1)->(N,): layout-preserving
    if tail:
        # Only the <=127-element tail gets padded; aligned batches take the
        # zero-copy path (kernel is the only HBM pass over the data).
        flat = jnp.pad(flat, (0, tail))
    slab = flat.reshape(rows, _LANE)       # contiguous -> bitcast reshape

    # Block sizing: ~1 MiB blocks amortize per-step overhead; keep >=2 grid
    # steps when possible so the "parallel" axis shards across v7x's 2 TCs.
    block_r = min(block_rows, max(_SUBLANE, _round_up(pl.cdiv(rows, 2), _SUBLANE)))
    if block_r >= rows:
        block_r = rows                     # single full-extent block
    grid = (pl.cdiv(rows, block_r),)       # ragged last block OK

    nbytes = n_slab * x.dtype.itemsize
    out = pl.pallas_call(
        _lreg_kernel,
        out_shape=jax.ShapeDtypeStruct((rows, _LANE), x.dtype),
        grid=grid,
        in_specs=[
            pl.BlockSpec(memory_space=pltpu.MemorySpace.SMEM),   # weight scalar
            pl.BlockSpec(memory_space=pltpu.MemorySpace.SMEM),   # bias scalar
            pl.BlockSpec((block_r, _LANE), lambda i: (i, 0)),    # x slab tile
        ],
        out_specs=pl.BlockSpec((block_r, _LANE), lambda i: (i, 0)),
        compiler_params=pltpu.CompilerParams(
            dimension_semantics=("parallel",),
        ),
        cost_estimate=pl.CostEstimate(
            flops=2 * n_slab, bytes_accessed=2 * nbytes + 8, transcendentals=0),
    )(weight.reshape(1), bias.reshape(1), slab)

    flat_out = out.reshape(-1)
    if tail:
        flat_out = flat_out[:n]
    return flat_out.reshape(n, out_f)


if __name__ == "__main__":
    key = jax.random.PRNGKey(0)
    k_x1, k_x2, k_x3, k_w, k_b = jax.random.split(key, 5)

    in_features, out_features = 1, 1

    # Deterministic parameter init mimicking PyTorch Linear default:
    # U(-1/sqrt(in_features), 1/sqrt(in_features))
    bound = 1.0 / (in_features ** 0.5)
    weight = jax.random.uniform(k_w, (out_features, in_features),
                                minval=-bound, maxval=bound, dtype=jnp.float32)
    bias = jax.random.uniform(k_b, (out_features,),
                              minval=-bound, maxval=bound, dtype=jnp.float32)

    def ref(x):
        return x @ weight.T + bias

    # Case 1: the module's stated max_batch_size=2 -> default fused-XLA fast path.
    x_small = jax.random.normal(k_x1, (2, in_features), dtype=jnp.float32)
    y_small = jax.block_until_ready(lreg_forward(x_small, weight, bias))
    assert y_small.shape == (2, out_features)
    assert jnp.allclose(y_small, ref(x_small), atol=1e-6, rtol=1e-6)

    # Case 2: force the kernel path; 128-aligned batch -> zero-pad / zero-slice path.
    x_aligned = jax.random.normal(k_x2, (1024, in_features), dtype=jnp.float32)
    y_aligned = jax.block_until_ready(
        lreg_forward(x_aligned, weight, bias, min_kernel_elems=0))
    assert y_aligned.shape == (1024, out_features)
    assert jnp.allclose(y_aligned, ref(x_aligned), atol=1e-6, rtol=1e-6)

    # Case 3: force the kernel path with a small block so the grid has multiple
    # steps, a ragged final block, and a <128-element padded tail.
    x_ragged = jax.random.normal(k_x3, (2600, in_features), dtype=jnp.float32)
    y_ragged = jax.block_until_ready(
        lreg_forward(x_ragged, weight, bias, block_rows=8, min_kernel_elems=0))
    assert y_ragged.shape == (2600, out_features)
    assert jnp.allclose(y_ragged, ref(x_ragged), atol=1e-6, rtol=1e-6)

    print("KERNEL_OK")
</pallas_src>

<mosaic_0001>
module attributes {stable_mosaic.version = 11 : i64} {
  func.func @_lreg_kernel(%arg0: i32, %arg1: memref<1xf32, #tpu.memory_space<smem>>, %arg2: memref<1xf32, #tpu.memory_space<smem>>, %arg3: memref<8x128xf32, #tpu.memory_space<vmem>>, %arg4: memref<8x128xf32, #tpu.memory_space<vmem>>) attributes {dimension_semantics = [#tpu.dimension_semantics<parallel>], iteration_bounds = array<i64: 1>, scalar_prefetch = 0 : i64, scratch_operands = 0 : i64, tpu.core_type = #tpu.core_type<tc>, window_params = [{transform_indices = @transform_0, window_bounds = array<i64: 1>}, {transform_indices = @transform_1, window_bounds = array<i64: 1>}, {transform_indices = @transform_2, window_bounds = array<i64: 8, 128>}, {transform_indices = @transform_3, window_bounds = array<i64: 8, 128>}]} {
    %c0 = arith.constant 0 : index
    %c0_0 = arith.constant 0 : index
    %0 = vector.load %arg3[%c0, %c0_0] : memref<8x128xf32, #tpu.memory_space<vmem>>, vector<8x128xf32>
    %c0_1 = arith.constant 0 : index
    %1 = memref.load %arg1[%c0_1] : memref<1xf32, #tpu.memory_space<smem>>
    %2 = vector.broadcast %1 : f32 to vector<8x128xf32>
    %3 = arith.mulf %0, %2 : vector<8x128xf32>
    %c0_2 = arith.constant 0 : index
    %4 = memref.load %arg2[%c0_2] : memref<1xf32, #tpu.memory_space<smem>>
    %5 = vector.broadcast %4 : f32 to vector<8x128xf32>
    %6 = arith.addf %3, %5 : vector<8x128xf32>
    %c0_3 = arith.constant 0 : index
    %c0_4 = arith.constant 0 : index
    %7 = vector.load %arg4[%c0_3, %c0_4] : memref<8x128xf32, #tpu.memory_space<vmem>>, vector<8x128xf32>
    tpu.vector_store %arg4[%c0_3, %c0_4], %6 {strides = array<i32>} : memref<8x128xf32, #tpu.memory_space<vmem>>, vector<8x128xf32>,
    return
  }
  func.func @transform_0(%arg0: i32) -> i32 {
    %c0_i32 = arith.constant 0 : i32
    %c0_i32_0 = arith.constant 0 : i32
    return %c0_i32 : i32
  }
  func.func @transform_1(%arg0: i32) -> i32 {
    %c0_i32 = arith.constant 0 : i32
    %c0_i32_0 = arith.constant 0 : i32
    return %c0_i32 : i32
  }
  func.func @transform_2(%arg0: i32) -> (i32, i32) {
    %c0_i32 = arith.constant 0 : i32
    %c0_i32_0 = arith.constant 0 : i32
    return %arg0, %c0_i32 : i32, i32
  }
  func.func @transform_3(%arg0: i32) -> (i32, i32) {
    %c0_i32 = arith.constant 0 : i32
    %c0_i32_0 = arith.constant 0 : i32
    return %arg0, %c0_i32 : i32, i32
  }
}

</mosaic_0001>

<bundles_post_ra>
// kernel: tpu_custom_call.1
= control target key start
LH: loop header
LB: loop body
LE: loop exit
PB: predicated region body
PF: predicated region fallthrough
CT: control target
= control target key end

     0   :  { %10 = vsyncpa [#allocation5], 0  ;;  %s132_s0 = inlined_call_operand.<no memory space> [shape: f32[1], index: 0, kind: input, shape index: {}]   ;;  %s133_s1 = inlined_call_operand.<no memory space> [shape: f32[1], index: 1, kind: input, shape index: {}]   ;;  %s134_s2 = inlined_call_operand.hbm [shape: f32[8,128], index: 2, kind: input, shape index: {}]   ;;  %s135_s3 = inlined_call_operand.hbm [shape: f32[8,128], index: 3, kind: output, shape index: {}]  }
   0x1   :  { %11 = vsyncpa [#allocation6], 0  ;;  %s98_s12 = smov [#allocation4]  }
   0x2   :  { %s22_s13 = sshll.u32 %s98_s12, 4  ;;  %s23_s13 = int_to_ptr.vmem [resolvable:$true] %s22_s13 }
   0x3   :  { %s62_s14 = scalar_lea.vmem %s23_s13, 128  ;;  %p67_p1 = scmp.lt.s32.totalorder %s23_s13, %s23_s13 }
   0x4   :  { %p63_p0 = scmp.ne.s32.totalorder %s23_s13, %s62_s14  ;;  %p68_p2 = scmp.lt.s32.totalorder %s62_s14, %s62_s14 }
   0x6   :  { %p69_p3 = por %p68_p2, %p67_p1 }
   0x8   :  { %p70_p4 = pnand %p69_p3, %p63_p0 }
   0xa   :  { %73 = shalt.err (!%p70_p4)
}
   0xb   :  { %25 = dma.hbm_to_vmem [thread:$0]  %s134_s2, 128, %s23_s13, [#allocation5]  }
   0xc   :  { %94 = dma.done.wait [#allocation5], 128  }
   0xd   :  { %95 = vsyncadd [#allocation5], 4294967168  ;;  %v31_v0 = vstv %s132_s0  ;;  %v29_v1 = vld [vmem:[#allocation4] sm:$0xff]  ;;  %v34_v2 = vstv %s133_s1  ;;  %s99_s21 = smov [#allocation7]  }
   0xe   :  { %s43_s22 = sshll.u32 %s99_s21, 4  ;;  %v32_v3 = vmul.f32 %v31_v0, %v29_v1  ;;  %s44_s22 = int_to_ptr.vmem [resolvable:$true] %s43_s22 }
   0xf   :  { %s74_s23 = scalar_lea.vmem %s44_s22, 128  ;;  %p79_p6 = scmp.lt.s32.totalorder %s44_s22, %s44_s22 }
  0x10   :  { %v35_v4 = vadd.f32 %v34_v2, %v32_v3  ;;  %p75_p5 = scmp.ne.s32.totalorder %s44_s22, %s74_s23  ;;  %p80_p7 = scmp.lt.s32.totalorder %s74_s23, %s74_s23 }
  0x12   :  { %36 = vst [vmem:[#allocation7] sm:$0xff] %v35_v4  ;;  %p81_p8 = por %p80_p7, %p79_p6 }
  0x14   :  { %p82_p9 = pnand %p81_p8, %p75_p5 }
  0x16   :  { %85 = shalt.err (!%p82_p9)
}
  0x17   :  { %46 = dma.vmem_to_hbm [thread:$0]  %s44_s22, 128, %s135_s3, [#allocation6]  }
  0x18   :  { %96 = dma.done.wait [#allocation6], 128  }
  0x19   :  { %97 = vsyncadd [#allocation6], 4294967168 }
  0x1a   :  { %50 = vsyncpa [#allocation5], 1 }
  0x1b   :  { %51 = vsyncpa [#allocation6], 1 }

</bundles_post_ra>
